<compile_context>
chip_gen: v5e
topology: v5e:2x2
jax: 0.10.0
libtpu: 0.0.40
codegen_flags: <defaults>
</compile_context>

<pallas_src>
import functools

import jax
import jax.numpy as jnp
import numpy as np
from jax import lax
from jax.experimental import pallas as pl
from jax.experimental.pallas import tpu as pltpu


# --------------------------------------------------------------------------
# Fused kernel: LSTM (both questions, batch-concat) -> folded head -> match
# --------------------------------------------------------------------------
def fused_kernel(x_ref, wih_ref, whh_ref, b_ref, weff_ref, beff_ref,
                 x1_ref, x2_ref, pos_ref, neg_ref, s_scr,
                 *, T, BPB, TN, NB):
    # x_ref:    (T*BPB, Dw)  bf16, time-major rows for this batch block
    # wih_ref:  (Dw, 4H) bf16   whh_ref: (H, 4H) bf16   b_ref: (1, 4H) f32
    # weff_ref: (H, R) bf16     beff_ref: (1, R) f32    (folded eval-mode head)
    # x1_ref:   (BPB, R) bf16   x2_ref: (TN, BPB, R) bf16 (current N tile)
    # pos_ref:  (BPB, 1) f32    neg_ref: (NP, BPB) f32 (resident across N axis)
    # s_scr:    (BPB, R) f32 scratch holding seq_encode across the N axis
    n = pl.program_id(1)
    H = whh_ref.shape[0]
    H4 = whh_ref.shape[1]

    def lstm_head_and_pos():
        # Hoisted input projection: one MXU matmul for all T steps.
        gx = jnp.dot(x_ref[...], wih_ref[...],
                     preferred_element_type=jnp.float32) + b_ref[...]    # (T*BPB, 4H)
        whh = whh_ref[...]                                               # (H, 4H) bf16

        # sigmoid(x) = 0.5*tanh(x/2) + 0.5  ->  one full-width tanh per step
        # (lane-dependent pre-scale and post-affine; g-gate lanes keep tanh).
        lane = lax.broadcasted_iota(jnp.int32, (BPB, H4), 1)
        is_g = (lane >= 2 * H) & (lane < 3 * H)
        pre = jnp.where(is_g, 1.0, 0.5).astype(jnp.float32)
        post = pre
        shift = jnp.where(is_g, 0.0, 0.5).astype(jnp.float32)

        h = jnp.zeros((BPB, H), jnp.float32)
        c = jnp.zeros((BPB, H), jnp.float32)
        for t in range(T):                               # static unroll (T small)
            gates = gx[t * BPB:(t + 1) * BPB, :] + jnp.dot(
                h.astype(jnp.bfloat16), whh, preferred_element_type=jnp.float32)
            act = jnp.tanh(gates * pre) * post + shift
            i_g = act[:, 0 * H:1 * H]                    # PyTorch gate order i,f,g,o
            f_g = act[:, 1 * H:2 * H]
            g_g = act[:, 2 * H:3 * H]
            o_g = act[:, 3 * H:4 * H]
            c = f_g * c + i_g * g_g
            h = o_g * jnp.tanh(c)

        # Folded head: Linear -> BN(eval) -> Dropout(id) -> Linear == one affine.
        s = jnp.dot(h.astype(jnp.bfloat16), weff_ref[...],
                    preferred_element_type=jnp.float32) + beff_ref[...]  # (BPB, R)
        s_scr[...] = s
        pos_ref[...] = jnp.sum(s * x1_ref[...].astype(jnp.float32),
                               axis=1, keepdims=True)                    # (BPB, 1)

    if NB == 1:
        lstm_head_and_pos()
    else:
        pl.when(n == 0)(lstm_head_and_pos)

    # Negative scoring for the current N tile (x2 DMA pipelines against the
    # serial LSTM of the next batch block / next N tile).
    s = s_scr[...]                                                       # (BPB, R)
    x2 = x2_ref[...].astype(jnp.float32)                                 # (TN, BPB, R)
    neg_blk = jnp.sum(s[None, :, :] * x2, axis=2)                        # (TN, BPB)
    if NB == 1:
        neg_ref[...] = neg_blk
    else:
        start = pl.multiple_of(n * TN, TN)                               # TN==8 here
        neg_ref[pl.ds(start, TN), :] = neg_blk


def _fused_call(x, wih_t, whh_t, bias, w_eff, b_eff, x1, x2,
                *, T, BB, BPB, TN, NP):
    Dw = x.shape[-1]
    H, H4 = whh_t.shape
    R = w_eff.shape[1]
    BP = BB * BPB
    NB = NP // TN

    kernel = functools.partial(fused_kernel, T=T, BPB=BPB, TN=TN, NB=NB)
    return pl.pallas_call(
        kernel,
        out_shape=(jax.ShapeDtypeStruct((BP, 1), jnp.float32),
                   jax.ShapeDtypeStruct((BB, NP, BPB), jnp.float32)),
        grid=(BB, NB),
        in_specs=[
            pl.BlockSpec((None, T * BPB, Dw), lambda b, n: (b, 0, 0)),   # x (bf16)
            pl.BlockSpec((Dw, H4), lambda b, n: (0, 0)),                 # W_ih^T
            pl.BlockSpec((H, H4), lambda b, n: (0, 0)),                  # W_hh^T
            pl.BlockSpec((1, H4), lambda b, n: (0, 0)),                  # b_ih + b_hh
            pl.BlockSpec((H, R), lambda b, n: (0, 0)),                   # folded head W
            pl.BlockSpec((1, R), lambda b, n: (0, 0)),                   # folded head b
            pl.BlockSpec((BPB, R), lambda b, n: (b, 0)),                 # x1 (pos rel)
            pl.BlockSpec((TN, BPB, R), lambda b, n: (n, b, 0)),          # x2 (neg), N-tiled
        ],
        out_specs=(pl.BlockSpec((BPB, 1), lambda b, n: (b, 0)),          # pos column
                   pl.BlockSpec((None, NP, BPB), lambda b, n: (b, 0, 0))),  # neg block
        scratch_shapes=[pltpu.VMEM((BPB, R), jnp.float32)],              # seq_encode
        compiler_params=pltpu.CompilerParams(
            dimension_semantics=("parallel", "arbitrary"),
            vmem_limit_bytes=32 * 1024 * 1024),
    )(x, wih_t, whh_t, bias, w_eff, b_eff, x1, x2)


# --------------------------------------------------------------------------
# One-time parameter preparation (transpose, bias merge, head folding, casts)
# --------------------------------------------------------------------------
def prepare_params(p):
    eps = 1e-5
    scale = p["gamma"] / jnp.sqrt(p["rvar"] + eps)                  # (H,)
    shift = p["beta"] - p["rmean"] * scale                          # (H,)
    # seq_out in eval mode: ((h@W1 + b1)*scale + shift) @ W2 + b2
    w_eff = (p["w1"] * scale[None, :]) @ p["w2"]                    # (H, R)
    b_eff = (p["b1"] * scale + shift) @ p["w2"] + p["b2"]           # (R,)
    return {
        # Both encoders' word-embedding tables concatenated so one gather
        # serves both question encoders (indices offset by Vw).
        "word_embed_cat": jnp.concatenate(
            [p["word_embed"], p["word_embed2"]], axis=0).astype(jnp.bfloat16),
        "rel1_embed": p["rel1_embed"].astype(jnp.bfloat16),
        "rel2_embed": p["rel2_embed"].astype(jnp.bfloat16),
        "wih_t": jnp.transpose(p["w_ih"]).astype(jnp.bfloat16),     # (Dw, 4H)
        "whh_t": jnp.transpose(p["w_hh"]).astype(jnp.bfloat16),     # (H, 4H)
        "bias": (p["b_ih"] + p["b_hh"]).reshape(1, -1).astype(jnp.float32),
        "w_eff": w_eff.astype(jnp.bfloat16),
        "b_eff": b_eff.reshape(1, -1).astype(jnp.float32),
    }


# --------------------------------------------------------------------------
# Full RelationRanking forward (embedding gathers are glue; rest is one kernel)
# --------------------------------------------------------------------------
@jax.jit
def relation_ranking_forward(prepped, seqs, pos_rel1, pos_rel2, neg_rel1, neg_rel2):
    we_cat = prepped["word_embed_cat"]
    Vw = we_cat.shape[0] // 2
    Dw = we_cat.shape[1]
    B, T = seqs.shape
    N = neg_rel1.shape[0]
    B2 = 2 * B

    # Batch blocking: pad 2B to BP = BB*BPB (BPB multiple of 8; BB=2 once the
    # batch is big enough to feed both v7x TensorCores).
    if B2 <= 8:
        BB, BPB = 1, 8
    else:
        BB = 2
        BPB = -(-B2 // 16) * 8
    BP = BB * BPB

    # Negatives tiling along N (leading dim, so any tile size is legal).
    TN = N if N <= 8 else 8
    NP = -(-N // TN) * TN

    # Question tokens: gather embeddings for BOTH encoders directly into the
    # kernel's (batch_block, time-major) layout by transposing the *indices*.
    idx = jnp.concatenate([seqs, seqs + Vw], axis=0)                # (2B, T)
    idx = jnp.pad(idx, ((0, BP - B2), (0, 0)))                      # (BP, T)
    idx = idx.reshape(BB, BPB, T).transpose(0, 2, 1).reshape(BB, T * BPB)
    x = jnp.take(we_cat, idx, axis=0)                               # (BB, T*BPB, Dw) bf16

    # Relation embeddings (nn.Dropout in eval mode == identity).
    pos_rel1_e = jnp.take(prepped["rel1_embed"], pos_rel1, axis=0)  # (B, R)
    pos_rel2_e = jnp.take(prepped["rel2_embed"], pos_rel2, axis=0)  # (B, R)
    neg_rel1_e = jnp.take(prepped["rel1_embed"], neg_rel1, axis=0)  # (N, B, R)
    neg_rel2_e = jnp.take(prepped["rel2_embed"], neg_rel2, axis=0)  # (N, B, R)

    x1 = jnp.concatenate([pos_rel1_e, pos_rel2_e], axis=0)          # (2B, R)
    x1 = jnp.pad(x1, ((0, BP - B2), (0, 0)))                        # (BP, R)
    x2 = jnp.concatenate([neg_rel1_e, neg_rel2_e], axis=1)          # (N, 2B, R)
    x2 = jnp.pad(x2, ((0, NP - N), (0, BP - B2), (0, 0)))           # (NP, BP, R)

    pos_col, neg3 = _fused_call(
        x, prepped["wih_t"], prepped["whh_t"], prepped["bias"],
        prepped["w_eff"], prepped["b_eff"], x1, x2,
        T=T, BB=BB, BPB=BPB, TN=TN, NP=NP)

    pos_all = pos_col[:B2, 0]                                       # (B2,)
    neg_all = neg3.transpose(1, 0, 2).reshape(NP, BP)[:N, :B2]      # (N, B2)

    pos1 = jnp.broadcast_to(pos_all[None, :B], (N, B))
    pos2 = jnp.broadcast_to(pos_all[None, B:], (N, B))
    neg1, neg2 = neg_all[:, :B], neg_all[:, B:]
    return pos1, pos2, neg1, neg2


# --------------------------------------------------------------------------
# Pure-JAX f32 reference for correctness checking (unfolded, step-by-step)
# --------------------------------------------------------------------------
def _lstm_ref(x, w_ih, w_hh, b_ih, b_hh):
    B, T, _ = x.shape
    H = w_hh.shape[1]

    def step(carry, x_t):
        h, c = carry
        gates = x_t @ w_ih.T + h @ w_hh.T + b_ih + b_hh
        i = jax.nn.sigmoid(gates[:, :H])
        f = jax.nn.sigmoid(gates[:, H:2 * H])
        g = jnp.tanh(gates[:, 2 * H:3 * H])
        o = jax.nn.sigmoid(gates[:, 3 * H:])
        c = f * c + i * g
        h = o * jnp.tanh(c)
        return (h, c), None

    (h, _), _ = lax.scan(step, (jnp.zeros((B, H)), jnp.zeros((B, H))),
                         jnp.transpose(x, (1, 0, 2)))
    return h


def _forward_ref(params, seqs, pos_rel1, pos_rel2, neg_rel1, neg_rel2):
    def enc(x):
        h = _lstm_ref(x, params["w_ih"], params["w_hh"],
                      params["b_ih"], params["b_hh"])
        z = h @ params["w1"] + params["b1"]
        zn = (z - params["rmean"]) / jnp.sqrt(params["rvar"] + 1e-5)
        zn = zn * params["gamma"] + params["beta"]
        return zn @ params["w2"] + params["b2"]

    def ms(s, x1, x2):
        pos = jnp.sum(s * x1, axis=1)
        pos = jnp.broadcast_to(pos[None, :], (x2.shape[0], x2.shape[1]))
        neg = jnp.sum(s[None, :, :] * x2, axis=2)
        return pos, neg

    inp = jnp.take(params["word_embed"], seqs, axis=0)
    inp2 = jnp.take(params["word_embed2"], seqs, axis=0)
    s1 = enc(inp)
    s2 = enc(inp2)
    p1, n1 = ms(s1, jnp.take(params["rel1_embed"], pos_rel1, axis=0),
                jnp.take(params["rel1_embed"], neg_rel1, axis=0))
    p2, n2 = ms(s2, jnp.take(params["rel2_embed"], pos_rel2, axis=0),
                jnp.take(params["rel2_embed"], neg_rel2, axis=0))
    return p1, p2, n1, n2


# --------------------------------------------------------------------------
if __name__ == "__main__":
    # Small config: d_word_embed=32, d_hidden=32, d_rel_embed=32
    B, T, N = 2, 8, 4
    Dw, H, R = 32, 32, 32
    Vw, Vr1, Vr2 = 50, 20, 20

    key = jax.random.PRNGKey(0)
    ks = jax.random.split(key, 16)
    f32 = jnp.float32
    params = {
        "word_embed":  0.1 * jax.random.normal(ks[0], (Vw, Dw), f32),
        "word_embed2": 0.1 * jax.random.normal(ks[1], (Vw, Dw), f32),
        "rel1_embed":  0.1 * jax.random.normal(ks[2], (Vr1, R), f32),
        "rel2_embed":  0.1 * jax.random.normal(ks[3], (Vr2, R), f32),
        # LSTM params in PyTorch layout: weight_ih (4H, Dw), weight_hh (4H, H)
        "w_ih": 0.1 * jax.random.normal(ks[4], (4 * H, Dw), f32),
        "w_hh": 0.1 * jax.random.normal(ks[5], (4 * H, H), f32),
        "b_ih": 0.05 * jax.random.normal(ks[6], (4 * H,), f32),
        "b_hh": 0.05 * jax.random.normal(ks[7], (4 * H,), f32),
        # seq_out: Linear(H,H) -> BatchNorm1d(H) -> Linear(H,R), weights stored (in,out)
        "w1": 0.1 * jax.random.normal(ks[8], (H, H), f32),
        "b1": 0.05 * jax.random.normal(ks[9], (H,), f32),
        "gamma": 1.0 + 0.1 * jax.random.normal(ks[10], (H,), f32),
        "beta": 0.05 * jax.random.normal(ks[11], (H,), f32),
        "rmean": 0.05 * jax.random.normal(ks[12], (H,), f32),
        "rvar": 1.0 + 0.1 * jax.nn.softplus(jax.random.normal(ks[13], (H,), f32)),
        "w2": 0.1 * jax.random.normal(ks[14], (H, R), f32),
        "b2": 0.05 * jax.random.normal(ks[15], (R,), f32),
    }

    dkeys = jax.random.split(jax.random.PRNGKey(1), 5)
    seqs = jax.random.randint(dkeys[0], (B, T), 0, Vw)
    pos_rel1 = jax.random.randint(dkeys[1], (B,), 0, Vr1)
    pos_rel2 = jax.random.randint(dkeys[2], (B,), 0, Vr2)
    neg_rel1 = jax.random.randint(dkeys[3], (N, B), 0, Vr1)
    neg_rel2 = jax.random.randint(dkeys[4], (N, B), 0, Vr2)

    prepped = prepare_params(params)                     # one-time weight prep
    outs = relation_ranking_forward(prepped, seqs, pos_rel1, pos_rel2,
                                    neg_rel1, neg_rel2)
    outs = jax.block_until_ready(outs)

    refs = _forward_ref(params, seqs, pos_rel1, pos_rel2, neg_rel1, neg_rel2)
    # bf16 MXU operands (f32 accumulation, f32 h/c/gates) quantize at ~2^-8
    # relative; observed error is ~1e-3-scale, so 1e-2 gives ample margin.
    for o, r in zip(outs, refs):
        assert o.shape == (N, B), o.shape
        np.testing.assert_allclose(np.asarray(o), np.asarray(r),
                                   atol=1e-2, rtol=1e-2)

    print("KERNEL_OK")
</pallas_src>

<mosaic_0001>
module attributes {stable_mosaic.version = 11 : i64} {
  func.func @fused_kernel(%arg0: i32, %arg1: i32, %arg2: memref<1x64x32xbf16, #tpu.memory_space<vmem>>, %arg3: memref<32x128xbf16, #tpu.memory_space<vmem>>, %arg4: memref<32x128xbf16, #tpu.memory_space<vmem>>, %arg5: memref<1x128xf32, #tpu.memory_space<vmem>>, %arg6: memref<32x32xbf16, #tpu.memory_space<vmem>>, %arg7: memref<1x32xf32, #tpu.memory_space<vmem>>, %arg8: memref<8x32xbf16, #tpu.memory_space<vmem>>, %arg9: memref<4x8x32xbf16, #tpu.memory_space<vmem>>, %arg10: memref<8x1xf32, #tpu.memory_space<vmem>>, %arg11: memref<1x4x8xf32, #tpu.memory_space<vmem>>, %arg12: memref<8x32xf32, #tpu.memory_space<vmem>>) attributes {dimension_semantics = [#tpu.dimension_semantics<parallel>, #tpu.dimension_semantics<arbitrary>], iteration_bounds = array<i64: 1, 1>, scalar_prefetch = 0 : i64, scratch_operands = 1 : i64, tpu.core_type = #tpu.core_type<tc>, window_params = [{transform_indices = @transform_0, window_bounds = array<i64: 1, 64, 32>}, {pipeline_mode = #tpu.pipeline_mode<synchronous>, transform_indices = @transform_1, window_bounds = array<i64: 32, 128>}, {pipeline_mode = #tpu.pipeline_mode<synchronous>, transform_indices = @transform_2, window_bounds = array<i64: 32, 128>}, {pipeline_mode = #tpu.pipeline_mode<synchronous>, transform_indices = @transform_3, window_bounds = array<i64: 1, 128>}, {pipeline_mode = #tpu.pipeline_mode<synchronous>, transform_indices = @transform_4, window_bounds = array<i64: 32, 32>}, {pipeline_mode = #tpu.pipeline_mode<synchronous>, transform_indices = @transform_5, window_bounds = array<i64: 1, 32>}, {transform_indices = @transform_6, window_bounds = array<i64: 8, 32>}, {transform_indices = @transform_7, window_bounds = array<i64: 4, 8, 32>}, {transform_indices = @transform_8, window_bounds = array<i64: 8, 1>}, {transform_indices = @transform_9, window_bounds = array<i64: 1, 4, 8>}]} {
    %c0 = arith.constant 0 : index
    %c0_0 = arith.constant 0 : index
    %c0_1 = arith.constant 0 : index
    %0 = vector.load %arg2[%c0, %c0_0, %c0_1] : memref<1x64x32xbf16, #tpu.memory_space<vmem>>, vector<1x64x32xbf16>
    %1 = vector.shape_cast %0 : vector<1x64x32xbf16> to vector<64x32xbf16>
    %c0_2 = arith.constant 0 : index
    %c0_3 = arith.constant 0 : index
    %2 = vector.load %arg3[%c0_2, %c0_3] : memref<32x128xbf16, #tpu.memory_space<vmem>>, vector<32x128xbf16>
    %cst = arith.constant dense<0.000000e+00> : vector<64x128xf32>
    %3 = tpu.matmul %1, %2, %cst {dimension_numbers = #tpu.dot_dimension_numbers<[1], [0], [0], [1], [0, 0, 1, 1], [], []>} : vector<64x32xbf16>, vector<32x128xbf16>, vector<64x128xf32> -> vector<64x128xf32>
    %c0_4 = arith.constant 0 : index
    %c0_5 = arith.constant 0 : index
    %4 = vector.load %arg5[%c0_4, %c0_5] : memref<1x128xf32, #tpu.memory_space<vmem>>, vector<1x128xf32>
    %5 = vector.broadcast %4 : vector<1x128xf32> to vector<64x128xf32>
    %6 = arith.addf %3, %5 : vector<64x128xf32>
    %c0_6 = arith.constant 0 : index
    %c0_7 = arith.constant 0 : index
    %7 = vector.load %arg4[%c0_6, %c0_7] : memref<32x128xbf16, #tpu.memory_space<vmem>>, vector<32x128xbf16>
    %8 = tpu.iota {dimensions = array<i32: 1>} : vector<8x128xi32>
    %c64_i32 = arith.constant 64 : i32
    %9 = vector.broadcast %c64_i32 : i32 to vector<8x128xi32>
    %10 = arith.cmpi sge, %8, %9 : vector<8x128xi32>
    %c96_i32 = arith.constant 96 : i32
    %11 = vector.broadcast %c96_i32 : i32 to vector<8x128xi32>
    %12 = arith.cmpi slt, %8, %11 : vector<8x128xi32>
    %13 = arith.andi %10, %12 : vector<8x128xi1>
    %cst_8 = arith.constant 1.000000e+00 : f32
    %cst_9 = arith.constant 5.000000e-01 : f32
    %14 = vector.broadcast %cst_8 : f32 to vector<8x128xf32>
    %15 = vector.broadcast %cst_9 : f32 to vector<8x128xf32>
    %16 = arith.select %13, %14, %15 : vector<8x128xi1>, vector<8x128xf32>
    %cst_10 = arith.constant 0.000000e+00 : f32
    %cst_11 = arith.constant 5.000000e-01 : f32
    %17 = vector.broadcast %cst_10 : f32 to vector<8x128xf32>
    %18 = vector.broadcast %cst_11 : f32 to vector<8x128xf32>
    %19 = arith.select %13, %17, %18 : vector<8x128xi1>, vector<8x128xf32>
    %cst_12 = arith.constant 0.000000e+00 : f32
    %20 = vector.broadcast %cst_12 : f32 to vector<8x32xf32>
    %cst_13 = arith.constant 0.000000e+00 : f32
    %21 = vector.broadcast %cst_13 : f32 to vector<8x32xf32>
    %22 = vector.extract_strided_slice %6 {offsets = [0, 0], sizes = [8, 128], strides = [1, 1]} : vector<64x128xf32> to vector<8x128xf32>
    %23 = arith.truncf %20 : vector<8x32xf32> to vector<8x32xbf16>
    %cst_14 = arith.constant dense<0.000000e+00> : vector<8x128xf32>
    %24 = tpu.matmul %23, %7, %cst_14 {dimension_numbers = #tpu.dot_dimension_numbers<[1], [0], [0], [1], [0, 0, 1, 1], [], []>} : vector<8x32xbf16>, vector<32x128xbf16>, vector<8x128xf32> -> vector<8x128xf32>
    %25 = arith.addf %22, %24 : vector<8x128xf32>
    %26 = arith.mulf %25, %16 : vector<8x128xf32>
    %27 = math.tanh %26 : vector<8x128xf32>
    %28 = arith.mulf %27, %16 : vector<8x128xf32>
    %29 = arith.addf %28, %19 : vector<8x128xf32>
    %30 = vector.extract_strided_slice %29 {offsets = [0, 0], sizes = [8, 32], strides = [1, 1]} : vector<8x128xf32> to vector<8x32xf32>
    %31 = vector.extract_strided_slice %29 {offsets = [0, 32], sizes = [8, 32], strides = [1, 1]} : vector<8x128xf32> to vector<8x32xf32>
    %32 = vector.extract_strided_slice %29 {offsets = [0, 64], sizes = [8, 32], strides = [1, 1]} : vector<8x128xf32> to vector<8x32xf32>
    %33 = vector.extract_strided_slice %29 {offsets = [0, 96], sizes = [8, 32], strides = [1, 1]} : vector<8x128xf32> to vector<8x32xf32>
    %34 = arith.mulf %31, %21 : vector<8x32xf32>
    %35 = arith.mulf %30, %32 : vector<8x32xf32>
    %36 = arith.addf %34, %35 : vector<8x32xf32>
    %37 = math.tanh %36 : vector<8x32xf32>
    %38 = arith.mulf %33, %37 : vector<8x32xf32>
    %39 = vector.extract_strided_slice %6 {offsets = [8, 0], sizes = [8, 128], strides = [1, 1]} : vector<64x128xf32> to vector<8x128xf32>
    %40 = arith.truncf %38 : vector<8x32xf32> to vector<8x32xbf16>
    %cst_15 = arith.constant dense<0.000000e+00> : vector<8x128xf32>
    %41 = tpu.matmul %40, %7, %cst_15 {dimension_numbers = #tpu.dot_dimension_numbers<[1], [0], [0], [1], [0, 0, 1, 1], [], []>} : vector<8x32xbf16>, vector<32x128xbf16>, vector<8x128xf32> -> vector<8x128xf32>
    %42 = arith.addf %39, %41 : vector<8x128xf32>
    %43 = arith.mulf %42, %16 : vector<8x128xf32>
    %44 = math.tanh %43 : vector<8x128xf32>
    %45 = arith.mulf %44, %16 : vector<8x128xf32>
    %46 = arith.addf %45, %19 : vector<8x128xf32>
    %47 = vector.extract_strided_slice %46 {offsets = [0, 0], sizes = [8, 32], strides = [1, 1]} : vector<8x128xf32> to vector<8x32xf32>
    %48 = vector.extract_strided_slice %46 {offsets = [0, 32], sizes = [8, 32], strides = [1, 1]} : vector<8x128xf32> to vector<8x32xf32>
    %49 = vector.extract_strided_slice %46 {offsets = [0, 64], sizes = [8, 32], strides = [1, 1]} : vector<8x128xf32> to vector<8x32xf32>
    %50 = vector.extract_strided_slice %46 {offsets = [0, 96], sizes = [8, 32], strides = [1, 1]} : vector<8x128xf32> to vector<8x32xf32>
    %51 = arith.mulf %48, %36 : vector<8x32xf32>
    %52 = arith.mulf %47, %49 : vector<8x32xf32>
    %53 = arith.addf %51, %52 : vector<8x32xf32>
    %54 = math.tanh %53 : vector<8x32xf32>
    %55 = arith.mulf %50, %54 : vector<8x32xf32>
    %56 = vector.extract_strided_slice %6 {offsets = [16, 0], sizes = [8, 128], strides = [1, 1]} : vector<64x128xf32> to vector<8x128xf32>
    %57 = arith.truncf %55 : vector<8x32xf32> to vector<8x32xbf16>
    %cst_16 = arith.constant dense<0.000000e+00> : vector<8x128xf32>
    %58 = tpu.matmul %57, %7, %cst_16 {dimension_numbers = #tpu.dot_dimension_numbers<[1], [0], [0], [1], [0, 0, 1, 1], [], []>} : vector<8x32xbf16>, vector<32x128xbf16>, vector<8x128xf32> -> vector<8x128xf32>
    %59 = arith.addf %56, %58 : vector<8x128xf32>
    %60 = arith.mulf %59, %16 : vector<8x128xf32>
    %61 = math.tanh %60 : vector<8x128xf32>
    %62 = arith.mulf %61, %16 : vector<8x128xf32>
    %63 = arith.addf %62, %19 : vector<8x128xf32>
    %64 = vector.extract_strided_slice %63 {offsets = [0, 0], sizes = [8, 32], strides = [1, 1]} : vector<8x128xf32> to vector<8x32xf32>
    %65 = vector.extract_strided_slice %63 {offsets = [0, 32], sizes = [8, 32], strides = [1, 1]} : vector<8x128xf32> to vector<8x32xf32>
    %66 = vector.extract_strided_slice %63 {offsets = [0, 64], sizes = [8, 32], strides = [1, 1]} : vector<8x128xf32> to vector<8x32xf32>
    %67 = vector.extract_strided_slice %63 {offsets = [0, 96], sizes = [8, 32], strides = [1, 1]} : vector<8x128xf32> to vector<8x32xf32>
    %68 = arith.mulf %65, %53 : vector<8x32xf32>
    %69 = arith.mulf %64, %66 : vector<8x32xf32>
    %70 = arith.addf %68, %69 : vector<8x32xf32>
    %71 = math.tanh %70 : vector<8x32xf32>
    %72 = arith.mulf %67, %71 : vector<8x32xf32>
    %73 = vector.extract_strided_slice %6 {offsets = [24, 0], sizes = [8, 128], strides = [1, 1]} : vector<64x128xf32> to vector<8x128xf32>
    %74 = arith.truncf %72 : vector<8x32xf32> to vector<8x32xbf16>
    %cst_17 = arith.constant dense<0.000000e+00> : vector<8x128xf32>
    %75 = tpu.matmul %74, %7, %cst_17 {dimension_numbers = #tpu.dot_dimension_numbers<[1], [0], [0], [1], [0, 0, 1, 1], [], []>} : vector<8x32xbf16>, vector<32x128xbf16>, vector<8x128xf32> -> vector<8x128xf32>
    %76 = arith.addf %73, %75 : vector<8x128xf32>
    %77 = arith.mulf %76, %16 : vector<8x128xf32>
    %78 = math.tanh %77 : vector<8x128xf32>
    %79 = arith.mulf %78, %16 : vector<8x128xf32>
    %80 = arith.addf %79, %19 : vector<8x128xf32>
    %81 = vector.extract_strided_slice %80 {offsets = [0, 0], sizes = [8, 32], strides = [1, 1]} : vector<8x128xf32> to vector<8x32xf32>
    %82 = vector.extract_strided_slice %80 {offsets = [0, 32], sizes = [8, 32], strides = [1, 1]} : vector<8x128xf32> to vector<8x32xf32>
    %83 = vector.extract_strided_slice %80 {offsets = [0, 64], sizes = [8, 32], strides = [1, 1]} : vector<8x128xf32> to vector<8x32xf32>
    %84 = vector.extract_strided_slice %80 {offsets = [0, 96], sizes = [8, 32], strides = [1, 1]} : vector<8x128xf32> to vector<8x32xf32>
    %85 = arith.mulf %82, %70 : vector<8x32xf32>
    %86 = arith.mulf %81, %83 : vector<8x32xf32>
    %87 = arith.addf %85, %86 : vector<8x32xf32>
    %88 = math.tanh %87 : vector<8x32xf32>
    %89 = arith.mulf %84, %88 : vector<8x32xf32>
    %90 = vector.extract_strided_slice %6 {offsets = [32, 0], sizes = [8, 128], strides = [1, 1]} : vector<64x128xf32> to vector<8x128xf32>
    %91 = arith.truncf %89 : vector<8x32xf32> to vector<8x32xbf16>
    %cst_18 = arith.constant dense<0.000000e+00> : vector<8x128xf32>
    %92 = tpu.matmul %91, %7, %cst_18 {dimension_numbers = #tpu.dot_dimension_numbers<[1], [0], [0], [1], [0, 0, 1, 1], [], []>} : vector<8x32xbf16>, vector<32x128xbf16>, vector<8x128xf32> -> vector<8x128xf32>
    %93 = arith.addf %90, %92 : vector<8x128xf32>
    %94 = arith.mulf %93, %16 : vector<8x128xf32>
    %95 = math.tanh %94 : vector<8x128xf32>
    %96 = arith.mulf %95, %16 : vector<8x128xf32>
    %97 = arith.addf %96, %19 : vector<8x128xf32>
    %98 = vector.extract_strided_slice %97 {offsets = [0, 0], sizes = [8, 32], strides = [1, 1]} : vector<8x128xf32> to vector<8x32xf32>
    %99 = vector.extract_strided_slice %97 {offsets = [0, 32], sizes = [8, 32], strides = [1, 1]} : vector<8x128xf32> to vector<8x32xf32>
    %100 = vector.extract_strided_slice %97 {offsets = [0, 64], sizes = [8, 32], strides = [1, 1]} : vector<8x128xf32> to vector<8x32xf32>
    %101 = vector.extract_strided_slice %97 {offsets = [0, 96], sizes = [8, 32], strides = [1, 1]} : vector<8x128xf32> to vector<8x32xf32>
    %102 = arith.mulf %99, %87 : vector<8x32xf32>
    %103 = arith.mulf %98, %100 : vector<8x32xf32>
    %104 = arith.addf %102, %103 : vector<8x32xf32>
    %105 = math.tanh %104 : vector<8x32xf32>
    %106 = arith.mulf %101, %105 : vector<8x32xf32>
    %107 = vector.extract_strided_slice %6 {offsets = [40, 0], sizes = [8, 128], strides = [1, 1]} : vector<64x128xf32> to vector<8x128xf32>
    %108 = arith.truncf %106 : vector<8x32xf32> to vector<8x32xbf16>
    %cst_19 = arith.constant dense<0.000000e+00> : vector<8x128xf32>
    %109 = tpu.matmul %108, %7, %cst_19 {dimension_numbers = #tpu.dot_dimension_numbers<[1], [0], [0], [1], [0, 0, 1, 1], [], []>} : vector<8x32xbf16>, vector<32x128xbf16>, vector<8x128xf32> -> vector<8x128xf32>
    %110 = arith.addf %107, %109 : vector<8x128xf32>
    %111 = arith.mulf %110, %16 : vector<8x128xf32>
    %112 = math.tanh %111 : vector<8x128xf32>
    %113 = arith.mulf %112, %16 : vector<8x128xf32>
    %114 = arith.addf %113, %19 : vector<8x128xf32>
    %115 = vector.extract_strided_slice %114 {offsets = [0, 0], sizes = [8, 32], strides = [1, 1]} : vector<8x128xf32> to vector<8x32xf32>
    %116 = vector.extract_strided_slice %114 {offsets = [0, 32], sizes = [8, 32], strides = [1, 1]} : vector<8x128xf32> to vector<8x32xf32>
    %117 = vector.extract_strided_slice %114 {offsets = [0, 64], sizes = [8, 32], strides = [1, 1]} : vector<8x128xf32> to vector<8x32xf32>
    %118 = vector.extract_strided_slice %114 {offsets = [0, 96], sizes = [8, 32], strides = [1, 1]} : vector<8x128xf32> to vector<8x32xf32>
    %119 = arith.mulf %116, %104 : vector<8x32xf32>
    %120 = arith.mulf %115, %117 : vector<8x32xf32>
    %121 = arith.addf %119, %120 : vector<8x32xf32>
    %122 = math.tanh %121 : vector<8x32xf32>
    %123 = arith.mulf %118, %122 : vector<8x32xf32>
    %124 = vector.extract_strided_slice %6 {offsets = [48, 0], sizes = [8, 128], strides = [1, 1]} : vector<64x128xf32> to vector<8x128xf32>
    %125 = arith.truncf %123 : vector<8x32xf32> to vector<8x32xbf16>
    %cst_20 = arith.constant dense<0.000000e+00> : vector<8x128xf32>
    %126 = tpu.matmul %125, %7, %cst_20 {dimension_numbers = #tpu.dot_dimension_numbers<[1], [0], [0], [1], [0, 0, 1, 1], [], []>} : vector<8x32xbf16>, vector<32x128xbf16>, vector<8x128xf32> -> vector<8x128xf32>
    %127 = arith.addf %124, %126 : vector<8x128xf32>
    %128 = arith.mulf %127, %16 : vector<8x128xf32>
    %129 = math.tanh %128 : vector<8x128xf32>
    %130 = arith.mulf %129, %16 : vector<8x128xf32>
    %131 = arith.addf %130, %19 : vector<8x128xf32>
    %132 = vector.extract_strided_slice %131 {offsets = [0, 0], sizes = [8, 32], strides = [1, 1]} : vector<8x128xf32> to vector<8x32xf32>
    %133 = vector.extract_strided_slice %131 {offsets = [0, 32], sizes = [8, 32], strides = [1, 1]} : vector<8x128xf32> to vector<8x32xf32>
    %134 = vector.extract_strided_slice %131 {offsets = [0, 64], sizes = [8, 32], strides = [1, 1]} : vector<8x128xf32> to vector<8x32xf32>
    %135 = vector.extract_strided_slice %131 {offsets = [0, 96], sizes = [8, 32], strides = [1, 1]} : vector<8x128xf32> to vector<8x32xf32>
    %136 = arith.mulf %133, %121 : vector<8x32xf32>
    %137 = arith.mulf %132, %134 : vector<8x32xf32>
    %138 = arith.addf %136, %137 : vector<8x32xf32>
    %139 = math.tanh %138 : vector<8x32xf32>
    %140 = arith.mulf %135, %139 : vector<8x32xf32>
    %141 = vector.extract_strided_slice %6 {offsets = [56, 0], sizes = [8, 128], strides = [1, 1]} : vector<64x128xf32> to vector<8x128xf32>
    %142 = arith.truncf %140 : vector<8x32xf32> to vector<8x32xbf16>
    %cst_21 = arith.constant dense<0.000000e+00> : vector<8x128xf32>
    %143 = tpu.matmul %142, %7, %cst_21 {dimension_numbers = #tpu.dot_dimension_numbers<[1], [0], [0], [1], [0, 0, 1, 1], [], []>} : vector<8x32xbf16>, vector<32x128xbf16>, vector<8x128xf32> -> vector<8x128xf32>
    %144 = arith.addf %141, %143 : vector<8x128xf32>
    %145 = arith.mulf %144, %16 : vector<8x128xf32>
    %146 = math.tanh %145 : vector<8x128xf32>
    %147 = arith.mulf %146, %16 : vector<8x128xf32>
    %148 = arith.addf %147, %19 : vector<8x128xf32>
    %149 = vector.extract_strided_slice %148 {offsets = [0, 0], sizes = [8, 32], strides = [1, 1]} : vector<8x128xf32> to vector<8x32xf32>
    %150 = vector.extract_strided_slice %148 {offsets = [0, 32], sizes = [8, 32], strides = [1, 1]} : vector<8x128xf32> to vector<8x32xf32>
    %151 = vector.extract_strided_slice %148 {offsets = [0, 64], sizes = [8, 32], strides = [1, 1]} : vector<8x128xf32> to vector<8x32xf32>
    %152 = vector.extract_strided_slice %148 {offsets = [0, 96], sizes = [8, 32], strides = [1, 1]} : vector<8x128xf32> to vector<8x32xf32>
    %153 = arith.mulf %150, %138 : vector<8x32xf32>
    %154 = arith.mulf %149, %151 : vector<8x32xf32>
    %155 = arith.addf %153, %154 : vector<8x32xf32>
    %156 = math.tanh %155 : vector<8x32xf32>
    %157 = arith.mulf %152, %156 : vector<8x32xf32>
    %158 = arith.truncf %157 : vector<8x32xf32> to vector<8x32xbf16>
    %c0_22 = arith.constant 0 : index
    %c0_23 = arith.constant 0 : index
    %159 = vector.load %arg6[%c0_22, %c0_23] : memref<32x32xbf16, #tpu.memory_space<vmem>>, vector<32x32xbf16>
    %cst_24 = arith.constant dense<0.000000e+00> : vector<8x32xf32>
    %160 = tpu.matmul %158, %159, %cst_24 {dimension_numbers = #tpu.dot_dimension_numbers<[1], [0], [0], [1], [0, 0, 1, 1], [], []>} : vector<8x32xbf16>, vector<32x32xbf16>, vector<8x32xf32> -> vector<8x32xf32>
    %c0_25 = arith.constant 0 : index
    %c0_26 = arith.constant 0 : index
    %161 = vector.load %arg7[%c0_25, %c0_26] : memref<1x32xf32, #tpu.memory_space<vmem>>, vector<1x32xf32>
    %162 = vector.broadcast %161 : vector<1x32xf32> to vector<8x32xf32>
    %163 = arith.addf %160, %162 : vector<8x32xf32>
    %c0_27 = arith.constant 0 : index
    %c0_28 = arith.constant 0 : index
    %164 = vector.load %arg12[%c0_27, %c0_28] : memref<8x32xf32, #tpu.memory_space<vmem>>, vector<8x32xf32>
    tpu.vector_store %arg12[%c0_27, %c0_28], %163 {strides = array<i32>} : memref<8x32xf32, #tpu.memory_space<vmem>>, vector<8x32xf32>,
    %c0_29 = arith.constant 0 : index
    %c0_30 = arith.constant 0 : index
    %165 = vector.load %arg8[%c0_29, %c0_30] : memref<8x32xbf16, #tpu.memory_space<vmem>>, vector<8x32xbf16>
    %166 = arith.extf %165 : vector<8x32xbf16> to vector<8x32xf32>
    %167 = arith.mulf %163, %166 : vector<8x32xf32>
    %cst_31 = arith.constant dense<0.000000e+00> : vector<8xf32>
    %168 = vector.multi_reduction <add>, %167, %cst_31 [1] : vector<8x32xf32> to vector<8xf32>
    %169 = vector.shape_cast %168 : vector<8xf32> to vector<8x1xf32>
    %c0_32 = arith.constant 0 : index
    %c0_33 = arith.constant 0 : index
    %170 = vector.load %arg10[%c0_32, %c0_33] : memref<8x1xf32, #tpu.memory_space<vmem>>, vector<8x1xf32>
    tpu.vector_store %arg10[%c0_32, %c0_33], %169 {strides = array<i32>} : memref<8x1xf32, #tpu.memory_space<vmem>>, vector<8x1xf32>,
    %c0_34 = arith.constant 0 : index
    %c0_35 = arith.constant 0 : index
    %171 = vector.load %arg12[%c0_34, %c0_35] : memref<8x32xf32, #tpu.memory_space<vmem>>, vector<8x32xf32>
    %c0_36 = arith.constant 0 : index
    %c0_37 = arith.constant 0 : index
    %c0_38 = arith.constant 0 : index
    %172 = vector.load %arg9[%c0_36, %c0_37, %c0_38] : memref<4x8x32xbf16, #tpu.memory_space<vmem>>, vector<4x8x32xbf16>
    %173 = arith.extf %172 : vector<4x8x32xbf16> to vector<4x8x32xf32>
    %174 = vector.shape_cast %171 : vector<8x32xf32> to vector<1x8x32xf32>
    %175 = vector.broadcast %174 : vector<1x8x32xf32> to vector<4x8x32xf32>
    %176 = arith.mulf %175, %173 : vector<4x8x32xf32>
    %cst_39 = arith.constant dense<0.000000e+00> : vector<4x8xf32>
    %177 = vector.multi_reduction <add>, %176, %cst_39 [2] : vector<4x8x32xf32> to vector<4x8xf32>
    %c0_40 = arith.constant 0 : index
    %c0_41 = arith.constant 0 : index
    %c0_42 = arith.constant 0 : index
    %178 = vector.load %arg11[%c0_40, %c0_41, %c0_42] : memref<1x4x8xf32, #tpu.memory_space<vmem>>, vector<1x4x8xf32>
    %179 = vector.shape_cast %178 : vector<1x4x8xf32> to vector<4x8xf32>
    %180 = vector.shape_cast %177 : vector<4x8xf32> to vector<1x4x8xf32>
    tpu.vector_store %arg11[%c0_40, %c0_41, %c0_42], %180 {strides = array<i32>} : memref<1x4x8xf32, #tpu.memory_space<vmem>>, vector<1x4x8xf32>,
    return
  }
  func.func @transform_0(%arg0: i32, %arg1: i32) -> (i32, i32, i32) {
    %c0_i32 = arith.constant 0 : i32
    %c0_i32_0 = arith.constant 0 : i32
    %c0_i32_1 = arith.constant 0 : i32
    return %arg0, %c0_i32, %c0_i32_0 : i32, i32, i32
  }
  func.func @transform_1(%arg0: i32, %arg1: i32) -> (i32, i32) {
    %c0_i32 = arith.constant 0 : i32
    %c0_i32_0 = arith.constant 0 : i32
    %c0_i32_1 = arith.constant 0 : i32
    return %c0_i32, %c0_i32_0 : i32, i32
  }
  func.func @transform_2(%arg0: i32, %arg1: i32) -> (i32, i32) {
    %c0_i32 = arith.constant 0 : i32
    %c0_i32_0 = arith.constant 0 : i32
    %c0_i32_1 = arith.constant 0 : i32
    return %c0_i32, %c0_i32_0 : i32, i32
  }
  func.func @transform_3(%arg0: i32, %arg1: i32) -> (i32, i32) {
    %c0_i32 = arith.constant 0 : i32
    %c0_i32_0 = arith.constant 0 : i32
    %c0_i32_1 = arith.constant 0 : i32
    return %c0_i32, %c0_i32_0 : i32, i32
  }
  func.func @transform_4(%arg0: i32, %arg1: i32) -> (i32, i32) {
    %c0_i32 = arith.constant 0 : i32
    %c0_i32_0 = arith.constant 0 : i32
    %c0_i32_1 = arith.constant 0 : i32
    return %c0_i32, %c0_i32_0 : i32, i32
  }
  func.func @transform_5(%arg0: i32, %arg1: i32) -> (i32, i32) {
    %c0_i32 = arith.constant 0 : i32
    %c0_i32_0 = arith.constant 0 : i32
    %c0_i32_1 = arith.constant 0 : i32
    return %c0_i32, %c0_i32_0 : i32, i32
  }
  func.func @transform_6(%arg0: i32, %arg1: i32) -> (i32, i32) {
    %c0_i32 = arith.constant 0 : i32
    %c0_i32_0 = arith.constant 0 : i32
    return %arg0, %c0_i32 : i32, i32
  }
  func.func @transform_7(%arg0: i32, %arg1: i32) -> (i32, i32, i32) {
    %c0_i32 = arith.constant 0 : i32
    %c0_i32_0 = arith.constant 0 : i32
    return %arg1, %arg0, %c0_i32 : i32, i32, i32
  }
  func.func @transform_8(%arg0: i32, %arg1: i32) -> (i32, i32) {
    %c0_i32 = arith.constant 0 : i32
    %c0_i32_0 = arith.constant 0 : i32
    return %arg0, %c0_i32 : i32, i32
  }
  func.func @transform_9(%arg0: i32, %arg1: i32) -> (i32, i32, i32) {
    %c0_i32 = arith.constant 0 : i32
    %c0_i32_0 = arith.constant 0 : i32
    %c0_i32_1 = arith.constant 0 : i32
    return %arg0, %c0_i32, %c0_i32_0 : i32, i32, i32
  }
}

</mosaic_0001>

<bundles_post_ra>
// kernel: relation_ranking_forward.1
= control target key start
LH: loop header
LB: loop body
LE: loop exit
PB: predicated region body
PF: predicated region fallthrough
CT: control target
= control target key end

     0   :  { %vm80_vm0 = vcmask 261120   ;;  %v685_v5 = vmov 0   ;;  %v126_v6 = vlaneseq  ;;  %v686_v12 = vmov 0.5   ;;  %s688_s19 = smov 32   ;;  %s896_s1 = inlined_call_operand.vmem [shape: bf16[32,128], index: 1, kind: input, shape index: {}]   ;;  %s897_s2 = inlined_call_operand.vmem [shape: bf16[32,128], index: 2, kind: input, shape index: {}]   ;;  %s898_s3 = inlined_call_operand.vmem [shape: f32[1,128], index: 3, kind: input, shape index: {}]   ;;  %s899_s0 = inlined_call_operand.vmem [shape: bf16[1,64,32], index: 0, kind: input, shape index: {}]   ;;  %s900_s4 = inlined_call_operand.vmem [shape: bf16[32,32], index: 4, kind: input, shape index: {}]   ;;  %s901_s5 = inlined_call_operand.vmem [shape: f32[1,32], index: 5, kind: input, shape index: {}]   ;;  %s902_s7 = inlined_call_operand.vmem [shape: bf16[4,8,32], index: 7, kind: input, shape index: {}]   ;;  %s903_s6 = inlined_call_operand.vmem [shape: bf16[8,32], index: 6, kind: input, shape index: {}]   ;;  %s904_s9 = inlined_call_operand.vmem [shape: f32[1,4,8], index: 9, kind: output, shape index: {1}]   ;;  %s905_s8 = inlined_call_operand.vmem [shape: f32[8,1], index: 8, kind: output, shape index: {0}]  }
   0x1   :  { %v633_v0 = vld [vmem:[%s896_s1 + $0x8] sm:$0xff]  ;;  %v632_v2 = vld [vmem:[%s896_s1] sm:$0xff]  ;;  %vm559_vm4 = vcmask 1041409   ;;  %vm561_vm5 = vcmask 1042434   ;;  %vm563_vm6 = vcmask 1043459   ;;  %vm566_vm7 = vcmask 60416  }
   0x2   :  { %v745_v1 = vld [vmem:[%s897_s2 + $0x8] sm:$0xff]  ;;  %99 = vmatpush.bf16.msra.mxu0 %v633_v0  ;;  %v634_v3 = vld [vmem:[%s897_s2] sm:$0xff]  ;;  %v764_v7 = vand.u32 127, %v126_v6  ;;  %vm524_vm8 = vcmask 7168  }
   0x3   :  { %154 = vmatpush.bf16.msra.mxu1 %v745_v1  ;;  %196 = vmatpush.bf16.msra.mxu2 %v745_v1  ;;  %v628_v4 = vld [vmem:[%s899_s0] sm:$0xff]  ;;  %v629_v46 = vld [vmem:[%s899_s0 + $0x8] sm:$0xff] }
   0x4   :  { %238 = vmatpush.bf16.msra.mxu3 %v745_v1  ;;  %vm128_vm1 = vcmp.ge.s32.totalorder %v764_v7, 64  ;;  %vm129_vm2 = vcmp.lt.s32.totalorder %v764_v7, 96  ;;  %v771_v8 = vld [vmem:[%s898_s3] ss:$0 sm:$0xff]  ;;  %s687_s3 = smov 64  }
   0x5   :  { %vm130_vm3 = vmand %vm128_vm1, %vm129_vm2 }
   0x6   :  { %100 = vmatpush.bf16.msra.mxu0 %v632_v2  ;;  %v774_v13 = vsel %vm130_vm3, 1.0, %v686_v12  ;;  %v777_v18 = vsel %vm130_vm3, 0.0, %v686_v12 }
   0x7   :  { %155 = vmatpush.bf16.msra.mxu1 %v634_v3  ;;  %197 = vmatpush.bf16.msra.mxu2 %v634_v3 }
   0x8   :  { %239 = vmatpush.bf16.msra.mxu3 %v634_v3 }
   0x9   :  { %600 = vmatmul.msk.bf16.vlgmr.msra.gmra.mxu0 %vm80_vm0, %v628_v4 }
   0xa   :  { %156 = vmatmul.bf16.vlgmr.msra.gmra.mxu1 %v685_v5 }
   0xb   :  { %280 = vmatpush.bf16.msrb.mxu1 %v745_v1  ;;  %322 = vmatpush.bf16.msrb.mxu2 %v745_v1 }
   0xc   :  { %364 = vmatpush.bf16.msrb.mxu3 %v745_v1 }
   0xf   :  { %281 = vmatpush.bf16.msrb.mxu1 %v634_v3  ;;  %323 = vmatpush.bf16.msrb.mxu2 %v634_v3 }
  0x10   :  { %365 = vmatpush.bf16.msrb.mxu3 %v634_v3 }
  0x13   :  { %406 = vmatpush.bf16.msra.mxu1 %v745_v1 }
  0x17   :  { %407 = vmatpush.bf16.msra.mxu1 %v634_v3 }
  0x19   :  { %601 = vmatmul.msk.bf16.gmra.mxu0 %vm80_vm0, %v629_v46 }
  0x86   :  { %v102_v9 = vpop.f32.mrf.mxu0 }
  0x87   :  { %v157_v10 = vpop.f32.mrf.mxu1  ;;  %v103_v11 = vadd.f32 %v771_v8, %v102_v9 }
  0x89   :  { %v161_v14 = vadd.f32 %v157_v10, %v103_v11 }
  0x8b   :  { %v162_v15 = vmul.f32 %v161_v14, %v774_v13 }
  0x8d   :  { %653 = vtanh.f32 %v162_v15 }
  0x8e   :  { %v104_v31 = vpop.f32.mrf.mxu0 }
  0x8f   :  { %v159_v16 = vpop.f32.mrf.mxu1  ;;  %v105_v32 = vadd.f32 %v771_v8, %v104_v31 }
  0x93   :  { %v654_v17 = vpop.eup %653 }
  0x94   :  { %v164_v19 = vmul.f32 %v654_v17, %v774_v13 }
  0x96   :  { %v165_v20 = vadd.f32 %v164_v19, %v777_v18  ;;  %v107_v51 = vpop.f32.mrf.mxu0 }
  0x97   :  { %v108_v52 = vadd.f32 %v771_v8, %v107_v51 }
  0x98   :  { %168 = vrot.lane.b32.xlu0 %v165_v20, %s687_s3  ;;  %v166_v23 = vmul.f32 0.0, %v165_v20 }
  0x9e   :  { %v109_v6 = vpop.f32.mrf.mxu0 }
  0x9f   :  { %v110_v9 = vadd.f32 %v771_v8, %v109_v6 }
 0x10a   :  { %v169_v21 = vpop.permute.xlu0 %168 }
 0x10b   :  { %v171_v22 = vmul.f32 %v169_v21, %v165_v20 }
 0x10d   :  { %173 = vrot.lane.b32.xlu0 %v171_v22, %s688_s19 }
 0x17f   :  { %v174_v24 = vpop.permute.xlu0 %173 }
 0x180   :  { %v176_v25 = vadd.f32 %v174_v24, %v166_v23 }
 0x182   :  { %655 = vtanh.f32 %v176_v25 }
 0x188   :  { %v656_v26 = vpop.eup %655 }
 0x189   :  { %179 = vrot.lane.b32.xlu1 %v656_v26, %s687_s3 }
 0x1fb   :  { %v180_v27 = vpop.permute.xlu1 %179 }
 0x1fc   :  { %v182_v28 = vmul.f32 %v180_v27, %v165_v20 }
 0x1fe   :  { %v183_v29 = vpack.c.bf16 %v182_v28, %v182_v28 }
 0x200   :  { %185 = vrot.lane.b32.xlu1 %v183_v29, %s688_s19 }
 0x272   :  { %v186_v30 = vpop.permute.xlu1 %185 }
 0x273   :  { %612 = vmatmul.msk.bf16.vlgmr.msra.gmra.mxu2 %vm80_vm0, %v186_v30 }
 0x274   :  { %448 = vmatpush.bf16.msra.mxu2 %v745_v1 }
 0x278   :  { %449 = vmatpush.bf16.msra.mxu2 %v634_v3 }
 0x2f6   :  { %v199_v33 = vpop.f32.mrf.mxu2 }
 0x2f7   :  { %v203_v34 = vadd.f32 %v199_v33, %v105_v32 }
 0x2f9   :  { %v204_v35 = vmul.f32 %v203_v34, %v774_v13 }
 0x2fb   :  { %657 = vtanh.f32 %v204_v35 }
 0x2fe   :  { %v201_v36 = vpop.f32.mrf.mxu2 }
 0x301   :  { %v658_v37 = vpop.eup %657 }
 0x302   :  { %v206_v38 = vmul.f32 %v658_v37, %v774_v13 }
 0x304   :  { %v207_v39 = vadd.f32 %v206_v38, %v777_v18 }
 0x306   :  { %210 = vrot.lane.b32.xlu2 %v207_v39, %s687_s3  ;;  %v208_v42 = vmul.f32 %v207_v39, %v176_v25  ;;  %v630_v25 = vld [vmem:[%s899_s0 + $0x10] sm:$0xff] }
 0x307   :  { %602 = vmatmul.msk.bf16.gmra.mxu0 %vm80_vm0, %v630_v25 }
 0x360   :  { %v211_v40 = vpop.permute.xlu2 %210 }
 0x361   :  { %v213_v41 = vmul.f32 %v211_v40, %v207_v39 }
 0x363   :  { %215 = vrot.lane.b32.xlu2 %v213_v41, %s688_s19 }
 0x384   :  { %v112_v30 = vpop.f32.mrf.mxu0 }
 0x385   :  { %v113_v31 = vadd.f32 %v771_v8, %v112_v30 }
 0x3bd   :  { %v216_v43 = vpop.permute.xlu2 %215 }
 0x3be   :  { %v218_v44 = vadd.f32 %v216_v43, %v208_v42 }
 0x3c0   :  { %659 = vtanh.f32 %v218_v44 }
 0x3c6   :  { %v660_v45 = vpop.eup %659 }
 0x3c7   :  { %221 = vrot.lane.b32.xlu0 %v660_v45, %s687_s3 }
 0x439   :  { %v222_v47 = vpop.permute.xlu0 %221 }
 0x43a   :  { %v224_v48 = vmul.f32 %v222_v47, %v207_v39 }
 0x43c   :  { %v225_v49 = vpack.c.bf16 %v224_v48, %v224_v48 }
 0x43e   :  { %227 = vrot.lane.b32.xlu1 %v225_v49, %s688_s19  ;;  %v114_v49 = vpop.f32.mrf.mxu0 }
 0x4b0   :  { %v228_v50 = vpop.permute.xlu1 %227 }
 0x4b1   :  { %613 = vmatmul.msk.bf16.vlgmr.msra.gmra.mxu3 %vm80_vm0, %v228_v50  ;;  %v115_v50 = vadd.f32 %v771_v8, %v114_v49  ;;  %v646_v49 = vld [vmem:[%s902_s7 + $0x8] sm:$0xff]  }
 0x534   :  { %v241_v53 = vpop.f32.mrf.mxu3 }
 0x535   :  { %v245_v54 = vadd.f32 %v241_v53, %v108_v52 }
 0x537   :  { %v246_v55 = vmul.f32 %v245_v54, %v774_v13 }
 0x539   :  { %661 = vtanh.f32 %v246_v55 }
 0x53c   :  { %v243_v56 = vpop.f32.mrf.mxu3 }
 0x53f   :  { %v662_v57 = vpop.eup %661 }
 0x540   :  { %v248_v58 = vmul.f32 %v662_v57, %v774_v13 }
 0x542   :  { %v249_v59 = vadd.f32 %v248_v58, %v777_v18 }
 0x544   :  { %252 = vrot.lane.b32.xlu2 %v249_v59, %s687_s3  ;;  %v250_v62 = vmul.f32 %v249_v59, %v218_v44 }
 0x59e   :  { %v253_v60 = vpop.permute.xlu2 %252 }
 0x59f   :  { %v255_v61 = vmul.f32 %v253_v60, %v249_v59 }
 0x5a1   :  { %257 = vrot.lane.b32.xlu0 %v255_v61, %s688_s19 }
 0x613   :  { %v258_v63 = vpop.permute.xlu0 %257 }
 0x614   :  { %v260_v0 = vadd.f32 %v258_v63, %v250_v62 }
 0x616   :  { %663 = vtanh.f32 %v260_v0 }
 0x61c   :  { %v664_v1 = vpop.eup %663 }
 0x61d   :  { %263 = vrot.lane.b32.xlu1 %v664_v1, %s687_s3 }
 0x68f   :  { %v264_v2 = vpop.permute.xlu1 %263 }
 0x690   :  { %v266_v3 = vmul.f32 %v264_v2, %v249_v59 }
 0x692   :  { %v267_v4 = vpack.c.bf16 %v266_v3, %v266_v3 }
 0x694   :  { %269 = vrot.lane.b32.xlu2 %v267_v4, %s688_s19 }
 0x6ee   :  { %v270_v5 = vpop.permute.xlu2 %269 }
 0x6ef   :  { %614 = vmatmul.msk.bf16.vlgmr.msrb.gmra.mxu1 %vm80_vm0, %v270_v5 }
 0x76c   :  { %v283_v10 = vpop.f32.mrf.mxu1 }
 0x76d   :  { %v287_v11 = vadd.f32 %v283_v10, %v110_v9 }
 0x76f   :  { %v288_v12 = vmul.f32 %v287_v11, %v774_v13 }
 0x771   :  { %665 = vtanh.f32 %v288_v12 }
 0x774   :  { %v285_v14 = vpop.f32.mrf.mxu1 }
 0x777   :  { %v666_v15 = vpop.eup %665 }
 0x778   :  { %v290_v16 = vmul.f32 %v666_v15, %v774_v13 }
 0x77a   :  { %v291_v17 = vadd.f32 %v290_v16, %v777_v18 }
 0x77c   :  { %294 = vrot.lane.b32.xlu0 %v291_v17, %s687_s3  ;;  %v292_v21 = vmul.f32 %v291_v17, %v260_v0  ;;  %v631_v0 = vld [vmem:[%s899_s0 + $0x18] sm:$0xff] }
 0x77d   :  { %603 = vmatmul.msk.bf16.gmra.mxu0 %vm80_vm0, %v631_v0  ;;  %v518_v0 = vld [vmem:[%s903_s6] sm:$0xf] }
 0x7ee   :  { %v295_v19 = vpop.permute.xlu0 %294 }
 0x7ef   :  { %v297_v20 = vmul.f32 %v295_v19, %v291_v17 }
 0x7f1   :  { %299 = vrot.lane.b32.xlu1 %v297_v20, %s688_s19 }
 0x7fa   :  { %v117_v5 = vpop.f32.mrf.mxu0 }
 0x7fb   :  { %v118_v6 = vadd.f32 %v771_v8, %v117_v5 }
 0x863   :  { %v300_v22 = vpop.permute.xlu1 %299 }
 0x864   :  { %v302_v23 = vadd.f32 %v300_v22, %v292_v21 }
 0x866   :  { %667 = vtanh.f32 %v302_v23 }
 0x86c   :  { %v668_v24 = vpop.eup %667 }
 0x86d   :  { %305 = vrot.lane.b32.xlu2 %v668_v24, %s687_s3 }
 0x8c7   :  { %v306_v26 = vpop.permute.xlu2 %305 }
 0x8c8   :  { %v308_v27 = vmul.f32 %v306_v26, %v291_v17 }
 0x8ca   :  { %v309_v28 = vpack.c.bf16 %v308_v27, %v308_v27 }
 0x8cc   :  { %311 = vrot.lane.b32.xlu0 %v309_v28, %s688_s19  ;;  %v119_v28 = vpop.f32.mrf.mxu0 }
 0x93e   :  { %v312_v29 = vpop.permute.xlu0 %311 }
 0x93f   :  { %615 = vmatmul.msk.bf16.vlgmr.msrb.gmra.mxu2 %vm80_vm0, %v312_v29  ;;  %v120_v29 = vadd.f32 %v771_v8, %v119_v28 }
 0x9c2   :  { %v325_v32 = vpop.f32.mrf.mxu2 }
 0x9c3   :  { %v329_v33 = vadd.f32 %v325_v32, %v113_v31 }
 0x9c5   :  { %v330_v34 = vmul.f32 %v329_v33, %v774_v13 }
 0x9c7   :  { %669 = vtanh.f32 %v330_v34 }
 0x9ca   :  { %v327_v35 = vpop.f32.mrf.mxu2 }
 0x9cd   :  { %v670_v36 = vpop.eup %669 }
 0x9ce   :  { %v332_v37 = vmul.f32 %v670_v36, %v774_v13 }
 0x9d0   :  { %v333_v38 = vadd.f32 %v332_v37, %v777_v18 }
 0x9d2   :  { %336 = vrot.lane.b32.xlu1 %v333_v38, %s687_s3  ;;  %v334_v41 = vmul.f32 %v333_v38, %v302_v23 }
 0xa44   :  { %v337_v39 = vpop.permute.xlu1 %336 }
 0xa45   :  { %v339_v40 = vmul.f32 %v337_v39, %v333_v38 }
 0xa47   :  { %341 = vrot.lane.b32.xlu2 %v339_v40, %s688_s19 }
 0xaa1   :  { %v342_v42 = vpop.permute.xlu2 %341 }
 0xaa2   :  { %v344_v43 = vadd.f32 %v342_v42, %v334_v41  ;;  %v637_v42 = vld [vmem:[%s900_s4 + $0x8] sm:$0xff] }
 0xaa3   :  { %510 = vmatpush.bf16.msra.mxu3 %v637_v42 }
 0xaa4   :  { %671 = vtanh.f32 %v344_v43 }
 0xaaa   :  { %v672_v44 = vpop.eup %671 }
 0xaab   :  { %347 = vrot.lane.b32.xlu0 %v672_v44, %s687_s3 }
 0xb1d   :  { %v348_v45 = vpop.permute.xlu0 %347 }
 0xb1e   :  { %v350_v46 = vmul.f32 %v348_v45, %v333_v38 }
 0xb20   :  { %v351_v47 = vpack.c.bf16 %v350_v46, %v350_v46  ;;  %v652_v46 = vld [vmem:[%s901_s5] ss:$0 sm:$0xff] }
 0xb22   :  { %353 = vrot.lane.b32.xlu1 %v351_v47, %s688_s19 }
 0xb94   :  { %v354_v48 = vpop.permute.xlu1 %353 }
 0xb95   :  { %616 = vmatmul.msk.bf16.vlgmr.msrb.gmra.mxu3 %vm80_vm0, %v354_v48 }
 0xc18   :  { %v367_v51 = vpop.f32.mrf.mxu3 }
 0xc19   :  { %v371_v52 = vadd.f32 %v367_v51, %v115_v50  ;;  %v639_v50 = vld [vmem:[%s902_s7] sm:$0xff]   ;;  %v644_v51 = vunpack.c.l.bf16 %v646_v49 }
 0xc1b   :  { %v372_v53 = vmul.f32 %v371_v52, %v774_v13  ;;  %v641_v52 = vunpack.c.h.bf16 %v639_v50 }
 0xc1d   :  { %673 = vtanh.f32 %v372_v53  ;;  %v640_v53 = vunpack.c.l.bf16 %v639_v50 }
 0xc20   :  { %v369_v54 = vpop.f32.mrf.mxu3 }
 0xc23   :  { %v674_v55 = vpop.eup %673 }
 0xc24   :  { %v374_v56 = vmul.f32 %v674_v55, %v774_v13 }
 0xc26   :  { %v375_v57 = vadd.f32 %v374_v56, %v777_v18 }
 0xc28   :  { %378 = vrot.lane.b32.xlu2 %v375_v57, %s687_s3  ;;  %v376_v60 = vmul.f32 %v375_v57, %v344_v43 }
 0xc82   :  { %v379_v58 = vpop.permute.xlu2 %378 }
 0xc83   :  { %v381_v59 = vmul.f32 %v379_v58, %v375_v57 }
 0xc85   :  { %383 = vrot.lane.b32.xlu0 %v381_v59, %s688_s19 }
 0xcf7   :  { %v384_v61 = vpop.permute.xlu0 %383 }
 0xcf8   :  { %v386_v62 = vadd.f32 %v384_v61, %v376_v60 }
 0xcfa   :  { %675 = vtanh.f32 %v386_v62 }
 0xd00   :  { %v676_v63 = vpop.eup %675 }
 0xd01   :  { %389 = vrot.lane.b32.xlu1 %v676_v63, %s687_s3 }
 0xd73   :  { %v390_v1 = vpop.permute.xlu1 %389 }
 0xd74   :  { %v392_v2 = vmul.f32 %v390_v1, %v375_v57 }
 0xd76   :  { %v393_v3 = vpack.c.bf16 %v392_v2, %v392_v2  ;;  %v519_v2 = vunpack.c.l.bf16 %v518_v0 }
 0xd78   :  { %395 = vrot.lane.b32.xlu2 %v393_v3, %s688_s19 }
 0xdd2   :  { %v396_v4 = vpop.permute.xlu2 %395 }
 0xdd3   :  { %617 = vmatmul.msk.bf16.vlgmr.msra.gmra.mxu1 %vm80_vm0, %v396_v4 }
 0xe50   :  { %v409_v9 = vpop.f32.mrf.mxu1 }
 0xe51   :  { %v413_v10 = vadd.f32 %v409_v9, %v118_v6 }
 0xe53   :  { %v414_v11 = vmul.f32 %v413_v10, %v774_v13 }
 0xe55   :  { %677 = vtanh.f32 %v414_v11 }
 0xe58   :  { %v411_v12 = vpop.f32.mrf.mxu1 }
 0xe5b   :  { %v678_v14 = vpop.eup %677 }
 0xe5c   :  { %v416_v15 = vmul.f32 %v678_v14, %v774_v13 }
 0xe5e   :  { %v417_v16 = vadd.f32 %v416_v15, %v777_v18 }
 0xe60   :  { %420 = vrot.lane.b32.xlu0 %v417_v16, %s687_s3  ;;  %v418_v20 = vmul.f32 %v417_v16, %v386_v62  ;;  %v645_v62 = vunpack.c.h.bf16 %v646_v49 }
 0xed2   :  { %v421_v17 = vpop.permute.xlu0 %420 }
 0xed3   :  { %v423_v19 = vmul.f32 %v421_v17, %v417_v16 }
 0xed5   :  { %425 = vrot.lane.b32.xlu1 %v423_v19, %s688_s19 }
 0xf47   :  { %v426_v21 = vpop.permute.xlu1 %425 }
 0xf48   :  { %v428_v22 = vadd.f32 %v426_v21, %v418_v20 }
 0xf4a   :  { %679 = vtanh.f32 %v428_v22 }
 0xf50   :  { %v680_v23 = vpop.eup %679 }
 0xf51   :  { %431 = vrot.lane.b32.xlu2 %v680_v23, %s687_s3 }
 0xfab   :  { %v432_v24 = vpop.permute.xlu2 %431 }
 0xfac   :  { %v434_v25 = vmul.f32 %v432_v24, %v417_v16 }
 0xfae   :  { %v435_v26 = vpack.c.bf16 %v434_v25, %v434_v25 }
 0xfb0   :  { %437 = vrot.lane.b32.xlu0 %v435_v26, %s688_s19 }
0x1022   :  { %v438_v27 = vpop.permute.xlu0 %437 }
0x1023   :  { %618 = vmatmul.msk.bf16.vlgmr.msra.gmra.mxu2 %vm80_vm0, %v438_v27 }
0x10a6   :  { %v451_v30 = vpop.f32.mrf.mxu2 }
0x10a7   :  { %v455_v31 = vadd.f32 %v451_v30, %v120_v29 }
0x10a9   :  { %v456_v32 = vmul.f32 %v455_v31, %v774_v13 }
0x10ab   :  { %681 = vtanh.f32 %v456_v32 }
0x10ae   :  { %v453_v33 = vpop.f32.mrf.mxu2 }
0x10b1   :  { %v682_v34 = vpop.eup %681 }
0x10b2   :  { %v458_v35 = vmul.f32 %v682_v34, %v774_v13  ;;  %v636_v13 = vld [vmem:[%s900_s4] sm:$0xff] }
0x10b3   :  { %511 = vmatpush.bf16.msra.mxu3 %v636_v13 }
0x10b4   :  { %v459_v36 = vadd.f32 %v458_v35, %v777_v18 }
0x10b6   :  { %462 = vrot.lane.b32.xlu1 %v459_v36, %s687_s3  ;;  %v460_v39 = vmul.f32 %v459_v36, %v428_v22 }
0x1128   :  { %v463_v37 = vpop.permute.xlu1 %462 }
0x1129   :  { %v465_v38 = vmul.f32 %v463_v37, %v459_v36 }
0x112b   :  { %467 = vrot.lane.b32.xlu2 %v465_v38, %s688_s19 }
0x1185   :  { %v468_v40 = vpop.permute.xlu2 %467 }
0x1186   :  { %v470_v8 = vadd.f32 %v468_v40, %v460_v39 }
0x1188   :  { %683 = vtanh.f32 %v470_v8 }
0x118e   :  { %v684_v41 = vpop.eup %683 }
0x118f   :  { %473 = vrot.lane.b32.xlu0 %v684_v41, %s687_s3 }
0x1201   :  { %v474_v18 = vpop.permute.xlu0 %473 }
0x1202   :  { %v476_v43 = vmul.f32 %v474_v18, %v459_v36 }
0x1204   :  { %v477_v44 = vpack.c.bf16 %v476_v43, %v476_v43 }
0x1206   :  { %487 = vrot.lane.b32.xlu1 %v477_v44, %s688_s19 }
0x1278   :  { %v488_v45 = vpop.permute.xlu1 %487 }
0x1279   :  { %627 = vmatmul.msk.bf16.vlgmr.msra.gmra.mxu3 %vm80_vm0, %v488_v45 }
0x12fc   :  { %v513_v47 = vpop.f32.mrf.mxu3 }
0x12fd   :  { %v514_v48 = vadd.f32 %v652_v46, %v513_v47 }
0x12ff   :  { %517 = vst.msk [vmem:[#allocation2] sm:$0xff] %vm80_vm0, %v514_v48  ;;  %v520_v3 = vmul.f32 %v519_v2, %v514_v48 }
0x1301   :  { %v521_v4 = vsel %vm80_vm0, %v520_v3, 0.0 }
0x1304   :  { %v515_v54 = vpop.f32.mrf.mxu3 }
0x1306   :  { %v526_v55 = vld [vmem:[#allocation2] sm:$0xff] }
0x1307   :  { %v537_v56 = vmul.f32 %v644_v51, %v526_v55  ;;  %v536_v57 = vmul.f32 %v641_v52, %v526_v55  ;;  %v535_v58 = vmul.f32 %v640_v53, %v526_v55  ;;  %v538_v63 = vmul.f32 %v645_v62, %v526_v55 }
0x1309   :  { %v545_v59 = vsel %vm80_vm0, %v537_v56, 0.0  ;;  %v542_v60 = vsel %vm80_vm0, %v536_v57, 0.0  ;;  %v539_v61 = vsel %vm80_vm0, %v535_v58, 0.0  ;;  %v548_v1 = vsel %vm80_vm0, %v538_v63, 0.0 }
0x130a   :  { %546 = vadd.xlane.f32.xlu1 %v545_v59  ;;  %543 = vadd.xlane.f32.xlu0 %v542_v60 }
0x130b   :  { %540 = vadd.xlane.f32.xlu2 %v539_v61 }
0x1313   :  { %549 = vadd.xlane.f32.xlu2 %v548_v1 }
0x131b   :  { %522 = vadd.xlane.f32.xlu2 %v521_v4 }
0x137d   :  { %v544_v5 = vpop.xlane.xlu0 %543  ;;  %v547_v9 = vpop.xlane.xlu1 %546 }
0x137e   :  { %v541_v6 = vpop.xlane.xlu2 %540  ;;  %v556_v10 = vperm.slane %v544_v5, %v764_v7  ;;  %v557_v12 = vperm.slane %v547_v9, %v764_v7 }
0x137f   :  { %v555_v11 = vperm.slane %v541_v6, %v764_v7 }
0x1381   :  { %v560_v14 = vsel %vm559_vm4, %v556_v10, %v555_v11 }
0x1382   :  { %v562_v17 = vsel %vm561_vm5, %v557_v12, %v560_v14 }
0x1386   :  { %v550_v15 = vpop.xlane.xlu2 %549 }
0x1387   :  { %v558_v16 = vperm.slane %v550_v15, %v764_v7 }
0x1389   :  { %v564_v19 = vsel %vm563_vm6, %v558_v16, %v562_v17 }
0x138a   :  { %567 = vst.msk [vmem:[%s904_s9] sm:$0xf] %vm566_vm7, %v564_v19 }
0x138e   :  { %v523_v20 = vpop.xlane.xlu2 %522 }
0x138f   :  { %525 = vst.msk [vmem:[%s905_s8] sm:$0xff] %vm524_vm8, %v523_v20 }

</bundles_post_ra>
